<compile_context>
chip_gen: v7x
topology: tpu7x:2x2x1
jax: 0.10.0
libtpu: 0.0.40
codegen_flags: <defaults>
</compile_context>

<pallas_src>
import functools

import jax
import jax.numpy as jnp
from jax import lax
from jax.experimental import pallas as pl
from jax.experimental.pallas import tpu as pltpu

# Without this, f32 matmuls in the reference (and in interpret-mode execution
# of the in-kernel dots) drop to bf16 inputs on TPU, putting a ~3e-3 floor on
# the comparison.  The Pallas MXU path honors the same (HIGHEST) precision.
jax.config.update("jax_default_matmul_precision", "highest")


# ----------------------------- hardware helpers ------------------------------

@functools.lru_cache(maxsize=None)
def _vmem_capacity_bytes():
    try:
        return int(pltpu.get_tpu_info().vmem_capacity_bytes)
    except Exception:
        return 64 * 1024 * 1024  # conservative default: v7x per-TC VMEM


def _big_vmem():
    # v5e / v6e have 128 MiB VMEM per TensorCore; v7x only 64 MiB.
    return _vmem_capacity_bytes() >= 100 * 1024 * 1024


def _sublane(dtype):
    # Sublane packing: 8 for f32, 16 for bf16, 32 for 8-bit types.
    return max(8, (8 * 4) // jnp.dtype(dtype).itemsize)


def _compiler_params(dimension_semantics, vmem_estimate_bytes):
    # 2x headroom over the per-step estimate, floor at the default scoped
    # limit, cap at ~75% of physical VMEM (leaves compiler/internal scratch
    # headroom on v7x, lets v5e/v6e use their larger 128 MiB VMEM).
    cap = int(0.75 * _vmem_capacity_bytes())
    limit = int(min(max(2 * vmem_estimate_bytes, 32 * 1024 * 1024), cap))
    return pltpu.CompilerParams(dimension_semantics=dimension_semantics,
                                vmem_limit_bytes=limit)


def _pick_tile(n, pref, align):
    """Largest tile <= pref that divides n and respects `align`; else full n."""
    if n <= pref:
        return n
    t = (pref // align) * align
    while t >= align:
        if n % t == 0:
            return t
        t -= align
    # TODO(synk): fallback selects the full dimension for awkward sizes; for
    # very large, non-factorable dims this should pad + mask instead.
    return n


# ----------------------------- linear kernels -------------------------------

def _matmul_kernel(x_ref, w_ref, o_ref, acc_ref):
    @pl.when(pl.program_id(2) == 0)
    def _():
        acc_ref[...] = jnp.zeros_like(acc_ref)

    acc_ref[...] += jnp.dot(x_ref[...], w_ref[...],
                            preferred_element_type=jnp.float32)

    @pl.when(pl.program_id(2) == pl.num_programs(2) - 1)
    def _():
        o_ref[...] = acc_ref[...].astype(o_ref.dtype)


def _matmul_bias_kernel(x_ref, w_ref, b_ref, o_ref, acc_ref):
    @pl.when(pl.program_id(2) == 0)
    def _():
        acc_ref[...] = jnp.zeros_like(acc_ref)

    acc_ref[...] += jnp.dot(x_ref[...], w_ref[...],
                            preferred_element_type=jnp.float32)

    @pl.when(pl.program_id(2) == pl.num_programs(2) - 1)
    def _():
        o_ref[...] = (acc_ref[...]
                      + b_ref[...].astype(jnp.float32)).astype(o_ref.dtype)


def pallas_linear(x, w, b=None):
    """Tiled, pipelined y = x @ w (+ b).  x:(M,K), w:(K,N), b:(N,) -> (M,N)."""
    M, K = x.shape
    Kw, N = w.shape
    assert K == Kw
    itemsize = x.dtype.itemsize

    # Generation-aware tile preferences: bigger tiles on 128-MiB-VMEM chips
    # amortize the ~0.35 us/step grid overhead and cut the K-axis trip count.
    if _big_vmem():
        tm_pref, tn_pref, tk_pref = 512, 512, 1024
    else:
        tm_pref, tn_pref, tk_pref = 256, 256, 512

    tm = _pick_tile(M, tm_pref, _sublane(x.dtype))
    tn = _pick_tile(N, tn_pref, 128)
    tk = _pick_tile(K, tk_pref, 128)
    grid = (M // tm, N // tn, K // tk)

    # Double-buffered inputs (+bias) + double-buffered output + f32 acc.
    vmem_est = (2 * (tm * tk + tk * tn + tn) * itemsize
                + 2 * tm * tn * itemsize
                + tm * tn * 4)
    cost = pl.CostEstimate(
        flops=2 * M * N * K,
        transcendentals=0,
        bytes_accessed=(M * K + K * N + M * N + N) * itemsize)

    x_spec = pl.BlockSpec((tm, tk), lambda i, j, k: (i, k))
    w_spec = pl.BlockSpec((tk, tn), lambda i, j, k: (k, j))
    o_spec = pl.BlockSpec((tm, tn), lambda i, j, k: (i, j))
    out_shape = jax.ShapeDtypeStruct((M, N), x.dtype)
    scratch = [pltpu.VMEM((tm, tn), jnp.float32)]
    params = _compiler_params(("parallel", "parallel", "arbitrary"), vmem_est)

    if b is None:
        return pl.pallas_call(
            _matmul_kernel,
            out_shape=out_shape,
            grid=grid,
            in_specs=[x_spec, w_spec],
            out_specs=o_spec,
            scratch_shapes=scratch,
            compiler_params=params,
            cost_estimate=cost,
        )(x, w)

    b2 = b.reshape(1, N)
    b_spec = pl.BlockSpec((1, tn), lambda i, j, k: (0, j))
    return pl.pallas_call(
        _matmul_bias_kernel,
        out_shape=out_shape,
        grid=grid,
        in_specs=[x_spec, w_spec, b_spec],
        out_specs=o_spec,
        scratch_shapes=scratch,
        compiler_params=params,
        cost_estimate=cost,
    )(x, w, b2)


# -------------------------- flash attention kernel ---------------------------

def _flash_attn_kernel(q_ref, kv_ref, o_ref, m_ref, l_ref, acc_ref,
                       *, n_heads, head_dim):
    # Blocks: q (1, tq, H*D), kv (1, tk, 2*H*D) laid out [K_all | V_all],
    #         o (1, tq, H*D).
    # Scratch: m, l (H, tq, 1) f32; acc (H, tq, D) f32 (online softmax state).
    ki = pl.program_id(2)
    inner = n_heads * head_dim

    @pl.when(ki == 0)
    def _():
        m_ref[...] = jnp.full_like(m_ref, -jnp.inf)
        l_ref[...] = jnp.zeros_like(l_ref)
        acc_ref[...] = jnp.zeros_like(acc_ref)

    # 1/sqrt(d) is folded into the f32 Q-projection weight, so no per-step
    # scaling here and the MXU sees the input dtype unmodified.
    q = q_ref[0]                  # (tq, H*D)
    kv = kv_ref[0]                # (tk, 2*H*D) = [K heads 0..H-1 | V heads 0..H-1]

    # TODO(synk): for head_dim < 128 a block-diagonal multi-head packing (or a
    # head-major (B*H, L, D) layout) would fill the 256-deep MXU better; for
    # D <~ 128 the kernel is typically EUP(exp)-bound so this is second order.
    # TODO(synk): with many heads, switch this static unroll to lax.fori_loop
    # to bound live ranges of the (tq, tk) f32 temporaries.
    for h in range(n_heads):
        qh = q[:, h * head_dim:(h + 1) * head_dim]                      # (tq, D)
        kh = kv[:, h * head_dim:(h + 1) * head_dim]                     # (tk, D)
        vh = kv[:, inner + h * head_dim:inner + (h + 1) * head_dim]     # (tk, D)

        # q @ k^T without materializing a transpose of k.
        s = lax.dot_general(qh, kh, (((1,), (1,)), ((), ())),
                            preferred_element_type=jnp.float32)         # (tq, tk)

        m_prev = m_ref[h]                                               # (tq, 1)
        m_new = jnp.maximum(m_prev, jnp.max(s, axis=-1, keepdims=True))
        alpha = jnp.exp(m_prev - m_new)
        p = jnp.exp(s - m_new)                                          # f32

        l_ref[h] = alpha * l_ref[h] + jnp.sum(p, axis=-1, keepdims=True)
        acc_ref[h] = alpha * acc_ref[h] + lax.dot_general(
            p.astype(vh.dtype), vh, (((1,), (0,)), ((), ())),
            preferred_element_type=jnp.float32)
        m_ref[h] = m_new

    @pl.when(ki == pl.num_programs(2) - 1)
    def _():
        # Direct per-head stores at their lane offsets into the lane-dense
        # (tq, H*D) output block — no concatenate relayout.  The softmax
        # denominator uses an exact reciprocal (tiny (tq,1) tensor, once per
        # output tile) so accuracy stays at f32 level.
        for h in range(n_heads):
            inv_l = 1.0 / l_ref[h]                                      # (tq, 1)
            o_ref[0, :, h * head_dim:(h + 1) * head_dim] = (
                acc_ref[h] * inv_l).astype(o_ref.dtype)


def pallas_flash_mha(q, kv, n_heads, head_dim):
    """q: (B, Lq, H*D) (pre-scaled), kv: (B, Lk, 2*H*D) -> (B, Lq, H*D)."""
    B, Lq, inner = q.shape
    Lk = kv.shape[1]
    assert inner == n_heads * head_dim
    itemsize = q.dtype.itemsize

    # Prefer a large tq (halves KV HBM re-reads per doubling) over tk, which
    # mainly inflates the (tq, tk) f32 temporaries.  tk is both the lane width
    # of s/p and the PV contraction depth, so align it to 128.
    tq_pref = 512 if _big_vmem() else 256
    tk_pref = 256
    tq = _pick_tile(Lq, tq_pref, _sublane(q.dtype))
    tk = _pick_tile(Lk, tk_pref, 128)
    grid = (B, Lq // tq, Lk // tk)
    # NOTE(v7x): B * (Lq//tq) is the parallel extent split across the two
    # TensorCores; for B=1 long-sequence cases raise Lq//tq >= 2.

    vmem_est = (2 * (tq * inner + tk * 2 * inner) * itemsize   # q, kv (dbl-buf)
                + 2 * tq * inner * itemsize                    # out (dbl-buf)
                + n_heads * (2 * tq + tq * head_dim) * 4)      # m, l, acc
    cost = pl.CostEstimate(
        flops=4 * B * n_heads * Lq * Lk * head_dim,
        transcendentals=B * n_heads * Lq * Lk,
        bytes_accessed=(q.size + kv.size + q.size) * itemsize)

    kernel = functools.partial(_flash_attn_kernel, n_heads=n_heads,
                               head_dim=head_dim)
    return pl.pallas_call(
        kernel,
        out_shape=jax.ShapeDtypeStruct((B, Lq, inner), q.dtype),
        grid=grid,
        in_specs=[
            pl.BlockSpec((1, tq, inner), lambda b, qi, ki: (b, qi, 0)),
            pl.BlockSpec((1, tk, 2 * inner), lambda b, qi, ki: (b, ki, 0)),
        ],
        out_specs=pl.BlockSpec((1, tq, inner), lambda b, qi, ki: (b, qi, 0)),
        scratch_shapes=[
            pltpu.VMEM((n_heads, tq, 1), jnp.float32),         # m
            pltpu.VMEM((n_heads, tq, 1), jnp.float32),         # l
            pltpu.VMEM((n_heads, tq, head_dim), jnp.float32),  # acc
        ],
        compiler_params=_compiler_params(
            ("parallel", "parallel", "arbitrary"), vmem_est),
        cost_estimate=cost,
    )(q, kv)


# --------------------------------- module ------------------------------------

class AttentionPallas:
    """JAX/Pallas port of the PyTorch Attention module (eval mode)."""

    def __init__(self, dim, n_heads, head_dim, key, dropout=0.0):
        self.dim = dim
        self.n_heads = n_heads
        self.head_dim = head_dim
        self.inner_dim = n_heads * head_dim
        self.scale = head_dim ** (-0.5)
        self.dropout = dropout

        k1, k2, k3, k4, k5 = jax.random.split(key, 5)
        # Reference parameters (the PyTorch-equivalent math uses these).
        # Weights stored (in, out) so y = x @ W (+ b).  Deterministic init.
        self.w_q = (jax.random.normal(k1, (dim, self.inner_dim), jnp.float32)
                    * dim ** -0.5)
        self.w_k = (jax.random.normal(k2, (dim, self.inner_dim), jnp.float32)
                    * dim ** -0.5)
        self.w_v = (jax.random.normal(k3, (dim, self.inner_dim), jnp.float32)
                    * dim ** -0.5)
        self.w_out = (jax.random.normal(k4, (self.inner_dim, dim), jnp.float32)
                      * self.inner_dim ** -0.5)
        self.b_out = (jax.random.normal(k5, (dim,), jnp.float32)
                      * self.inner_dim ** -0.5)

        # Kernel-side parameters, precomputed once in f32:
        #  * 1/sqrt(d) folded into w_q: the attention kernel never rescales q
        #    (no per-ki-step VPU multiply, no low-precision pre-MXU scaling).
        #  * KV weight columns laid out [K_all_heads | V_all_heads] so the
        #    kernel's per-head k/v slices sit at h*D and inner+h*D lane
        #    offsets instead of an interleaved [k_h|v_h] pattern.
        self.w_q_scaled = self.w_q * self.scale
        self.w_kv = jnp.concatenate([self.w_k, self.w_v], axis=1)
        # TODO(synk): dropout is a no-op here (inference/eval semantics); not
        # implemented as a stochastic kernel.

    def __call__(self, fr, to):
        B, L_fr, _ = fr.shape
        L_to = to.shape[1]

        # Projections (tiled, pipelined matmul kernels). Layouts stay
        # (B, L, H*D) / (B, L, 2*H*D) lane-dense; heads are split inside the
        # attention kernel, so no wrapper transposes (no extra HBM passes).
        q = pallas_linear(fr.reshape(B * L_fr, self.dim), self.w_q_scaled)
        kv = pallas_linear(to.reshape(B * L_to, self.dim), self.w_kv)
        q = q.reshape(B, L_fr, self.inner_dim)
        kv = kv.reshape(B, L_to, 2 * self.inner_dim)

        # Flash-style scaled dot-product attention (online softmax).
        out = pallas_flash_mha(q, kv, self.n_heads, self.head_dim)

        # Output projection with bias.
        out = pallas_linear(out.reshape(B * L_fr, self.inner_dim),
                            self.w_out, self.b_out)
        return out.reshape(B, L_fr, self.dim)


# ------------------------------- reference -----------------------------------

def reference(fr, to, mod):
    """Pure-JAX mirror of the PyTorch forward (unscaled weights, scale on dots)."""
    B, L_fr, _ = fr.shape
    L_to = to.shape[1]
    H, D = mod.n_heads, mod.head_dim
    hp = lax.Precision.HIGHEST
    q = jnp.einsum("bld,dn->bln", fr, mod.w_q, precision=hp)
    k = jnp.einsum("bld,dn->bln", to, mod.w_k, precision=hp)
    v = jnp.einsum("bld,dn->bln", to, mod.w_v, precision=hp)
    q = q.reshape(B, L_fr, H, D).transpose(0, 2, 1, 3)
    k = k.reshape(B, L_to, H, D).transpose(0, 2, 1, 3)
    v = v.reshape(B, L_to, H, D).transpose(0, 2, 1, 3)
    dots = jnp.einsum("bhqd,bhkd->bhqk", q, k, precision=hp) * mod.scale
    attn = jax.nn.softmax(dots, axis=-1)
    out = jnp.einsum("bhqk,bhkd->bhqd", attn, v, precision=hp)
    out = out.transpose(0, 2, 1, 3).reshape(B, L_fr, H * D)
    return jnp.einsum("blk,kd->bld", out, mod.w_out, precision=hp) + mod.b_out


if __name__ == "__main__":
    key = jax.random.PRNGKey(0)
    k_fr, k_to, k_params = jax.random.split(key, 3)

    B, L_fr, L_to = 2, 8, 8
    dim, n_heads, head_dim = 32, 4, 8

    fr = jax.random.normal(k_fr, (B, L_fr, dim), jnp.float32)
    to = jax.random.normal(k_to, (B, L_to, dim), jnp.float32)

    mod = AttentionPallas(dim, n_heads, head_dim, key=k_params)

    out = jax.block_until_ready(mod(fr, to))

    ref = reference(fr, to, mod)
    assert out.shape == (B, L_fr, dim), out.shape
    # Tightened tolerance: exact reciprocal in the softmax normalization and
    # HIGHEST-precision f32 matmuls everywhere (kernel and reference).
    assert jnp.allclose(out, ref, atol=5e-4, rtol=5e-4), \
        float(jnp.max(jnp.abs(out - ref)))

    print("KERNEL_OK")
</pallas_src>

<mosaic_0001>
module attributes {stable_mosaic.version = 11 : i64} {
  func.func @_matmul_kernel(%arg0: i32, %arg1: i32, %arg2: i32, %arg3: memref<16x32xf32, #tpu.memory_space<vmem>>, %arg4: memref<32x32xf32, #tpu.memory_space<vmem>>, %arg5: memref<16x32xf32, #tpu.memory_space<vmem>>, %arg6: memref<16x32xf32, #tpu.memory_space<vmem>>) attributes {dimension_semantics = [#tpu.dimension_semantics<parallel>, #tpu.dimension_semantics<parallel>, #tpu.dimension_semantics<arbitrary>], iteration_bounds = array<i64: 1, 1, 1>, scalar_prefetch = 0 : i64, scratch_operands = 1 : i64, tpu.core_type = #tpu.core_type<tc>, window_params = [{transform_indices = @transform_0, window_bounds = array<i64: 16, 32>}, {transform_indices = @transform_1, window_bounds = array<i64: 32, 32>}, {transform_indices = @transform_2, window_bounds = array<i64: 16, 32>}]} {
    %c0_i32 = arith.constant 0 : i32
    %0 = arith.cmpi eq, %arg2, %c0_i32 : i32
    %1 = arith.extui %0 : i1 to i32
    %c0_i32_0 = arith.constant 0 : i32
    %2 = arith.cmpi ne, %1, %c0_i32_0 : i32
    scf.if %2 {
      %cst_10 = arith.constant 0.000000e+00 : f32
      %12 = vector.broadcast %cst_10 : f32 to vector<16x32xf32>
      %c0_11 = arith.constant 0 : index
      %c0_12 = arith.constant 0 : index
      %13 = vector.load %arg6[%c0_11, %c0_12] : memref<16x32xf32, #tpu.memory_space<vmem>>, vector<16x32xf32>
      tpu.vector_store %arg6[%c0_11, %c0_12], %12 {strides = array<i32>} : memref<16x32xf32, #tpu.memory_space<vmem>>, vector<16x32xf32>,
    } else {
    }
    %c0 = arith.constant 0 : index
    %c0_1 = arith.constant 0 : index
    %3 = vector.load %arg6[%c0, %c0_1] : memref<16x32xf32, #tpu.memory_space<vmem>>, vector<16x32xf32>
    %c0_2 = arith.constant 0 : index
    %c0_3 = arith.constant 0 : index
    %4 = vector.load %arg3[%c0_2, %c0_3] : memref<16x32xf32, #tpu.memory_space<vmem>>, vector<16x32xf32>
    %c0_4 = arith.constant 0 : index
    %c0_5 = arith.constant 0 : index
    %5 = vector.load %arg4[%c0_4, %c0_5] : memref<32x32xf32, #tpu.memory_space<vmem>>, vector<32x32xf32>
    %cst = arith.constant dense<0.000000e+00> : vector<16x32xf32>
    %6 = tpu.matmul %4, %5, %cst {dimension_numbers = #tpu.dot_dimension_numbers<[1], [0], [0], [1], [0, 0, 1, 1], [], []>, precision = #tpu.contract_precision<fp32>} : vector<16x32xf32>, vector<32x32xf32>, vector<16x32xf32> -> vector<16x32xf32>
    %7 = arith.addf %3, %6 : vector<16x32xf32>
    %c0_6 = arith.constant 0 : index
    %c0_7 = arith.constant 0 : index
    %8 = vector.load %arg6[%c0_6, %c0_7] : memref<16x32xf32, #tpu.memory_space<vmem>>, vector<16x32xf32>
    tpu.vector_store %arg6[%c0_6, %c0_7], %7 {strides = array<i32>} : memref<16x32xf32, #tpu.memory_space<vmem>>, vector<16x32xf32>,
    %c0_i32_8 = arith.constant 0 : i32
    %9 = arith.cmpi eq, %arg2, %c0_i32_8 : i32
    %10 = arith.extui %9 : i1 to i32
    %c0_i32_9 = arith.constant 0 : i32
    %11 = arith.cmpi ne, %10, %c0_i32_9 : i32
    scf.if %11 {
      %c0_10 = arith.constant 0 : index
      %c0_11 = arith.constant 0 : index
      %12 = vector.load %arg6[%c0_10, %c0_11] : memref<16x32xf32, #tpu.memory_space<vmem>>, vector<16x32xf32>
      %c0_12 = arith.constant 0 : index
      %c0_13 = arith.constant 0 : index
      %13 = vector.load %arg5[%c0_12, %c0_13] : memref<16x32xf32, #tpu.memory_space<vmem>>, vector<16x32xf32>
      tpu.vector_store %arg5[%c0_12, %c0_13], %12 {strides = array<i32>} : memref<16x32xf32, #tpu.memory_space<vmem>>, vector<16x32xf32>,
    } else {
    }
    return
  }
  func.func @transform_0(%arg0: i32, %arg1: i32, %arg2: i32) -> (i32, i32) {
    %c0_i32 = arith.constant 0 : i32
    return %arg0, %arg2 : i32, i32
  }
  func.func @transform_1(%arg0: i32, %arg1: i32, %arg2: i32) -> (i32, i32) {
    %c0_i32 = arith.constant 0 : i32
    return %arg2, %arg1 : i32, i32
  }
  func.func @transform_2(%arg0: i32, %arg1: i32, %arg2: i32) -> (i32, i32) {
    %c0_i32 = arith.constant 0 : i32
    return %arg0, %arg1 : i32, i32
  }
}

</mosaic_0001>

<bundles_post_ra>
// kernel: tpu_custom_call.1
= control target key start
LH: loop header
LB: loop body
LE: loop exit
PB: predicated region body
PF: predicated region fallthrough
CT: control target
= control target key end

     0   :  { %7 = vsyncpa [#allocation4], 0  ;;  %s943_s0 = inlined_call_operand.hbm [shape: f32[16,32], index: 0, kind: input, shape index: {}]   ;;  %s944_s1 = inlined_call_operand.hbm [shape: f32[32,32], index: 1, kind: input, shape index: {}]   ;;  %s945_s2 = inlined_call_operand.hbm [shape: f32[16,32], index: 2, kind: output, shape index: {}]  }
   0x1   :  { %8 = vsyncpa [#allocation7], 0 }
   0x2   :  { %9 = vsyncpa [#allocation5], 0  ;;  %s857_s9 = smov [#allocation3]   ;;  %s785_s13 = scalar_lea.hbm %s943_s0, 256 }
   0x3   :  { %s15_s10 = sshll.u32 %s857_s9, 4  ;;  %p786_p0 = scmp.ne.s32.totalorder %s943_s0, %s785_s13  ;;  %s16_s10 = int_to_ptr.vmem [resolvable:$true] %s15_s10 }
   0x4   :  { %p789_p1 = scmp.lt.u32.totalorder %s785_s13, %s943_s0 }
   0x6   :  { %p791_p2 = pnand %p789_p1, %p786_p0 }
   0x8   :  { %794 = shalt.err (!%p791_p2)
}
   0x9   :  { %s795_s18 = scalar_lea.vmem %s16_s10, 256  ;;  %p800_p4 = scmp.lt.s32.totalorder %s16_s10, %s16_s10 }
   0xa   :  { %p796_p3 = scmp.ne.s32.totalorder %s16_s10, %s795_s18  ;;  %p801_p5 = scmp.lt.s32.totalorder %s795_s18, %s795_s18 }
   0xc   :  { %p802_p6 = por %p801_p5, %p800_p4 }
   0xe   :  { %p803_p7 = pnand %p802_p6, %p796_p3 }
  0x10   :  { %806 = shalt.err (!%p803_p7)
}
  0x11   :  { %s858_s19 = smov 128   ;;  %s859_s20 = smov 8  }
  0x12   :  { %21 = dma.hbm_to_vmem [thread:$0]  %s943_s0, 256, %s16_s10, [#allocation4], %s858_s19, %s858_s19, %s859_s20  }
  0x13   :  { %s860_s23 = smov [#allocation6]   ;;  %s807_s27 = scalar_lea.hbm %s944_s1, 512 }
  0x14   :  { %s27_s24 = sshll.u32 %s860_s23, 4  ;;  %p808_p8 = scmp.ne.s32.totalorder %s944_s1, %s807_s27  ;;  %s28_s24 = int_to_ptr.vmem [resolvable:$true] %s27_s24 }
  0x15   :  { %p811_p9 = scmp.lt.u32.totalorder %s807_s27, %s944_s1 }
  0x17   :  { %p813_p10 = pnand %p811_p9, %p808_p8 }
  0x19   :  { %816 = shalt.err (!%p813_p10)
}
  0x1a   :  { %s817_s4 = scalar_lea.vmem %s28_s24, 512  ;;  %p822_p12 = scmp.lt.s32.totalorder %s28_s24, %s28_s24 }
  0x1b   :  { %p818_p11 = scmp.ne.s32.totalorder %s28_s24, %s817_s4  ;;  %p823_p13 = scmp.lt.s32.totalorder %s817_s4, %s817_s4 }
  0x1d   :  { %p824_p0 = por %p823_p13, %p822_p12 }
  0x1f   :  { %p825_p1 = pnand %p824_p0, %p818_p11 }
  0x21   :  { %828 = shalt.err (!%p825_p1)
}
  0x22   :  { %33 = dma.hbm_to_vmem [thread:$0]  %s944_s1, 512, %s28_s24, [#allocation7], %s858_s19, %s858_s19, %s859_s20  }
  0x23   :  { %851 = dma.done.wait [#allocation4], 256  }
  0x24   :  { %852 = vsyncadd [#allocation4], 4294967040 }
  0x25   :  { %853 = dma.done.wait [#allocation7], 512  }
  0x26   :  { %854 = vsyncadd [#allocation7], 4294966784  ;;  %vm44_vm0 = vcmask 261120   ;;  %v51_v0 = vld [vmem:[#allocation6] sm:$0xff]  ;;  %v52_v1 = vld [vmem:[#allocation6 + $0x8] sm:$0xff]  ;;  %v861_v46 = vmov 0.0  }
  0x27   :  { %v53_v2 = vld [vmem:[#allocation6 + $0x10] sm:$0xff]  ;;  %v63_v3 = vand.u32 4294901760, %v51_v0  ;;  %v66_v4 = vand.u32 4294901760, %v52_v1  ;;  %v54_v5 = vld [vmem:[#allocation6 + $0x18] sm:$0xff]  ;;  %46 = vst.msk [vmem:[#allocation2 + $0x8] sm:$0xff] %vm44_vm0, %v861_v46  ;;  %45 = vst.msk [vmem:[#allocation2] sm:$0xff] %vm44_vm0, %v861_v46 }
  0x28   :  { %v69_v6 = vand.u32 4294901760, %v53_v2  ;;  %v49_v7 = vld [vmem:[#allocation3] sm:$0xff]  ;;  %v50_v8 = vld [vmem:[#allocation3 + $0x8] sm:$0xff]  ;;  %v72_v9 = vand.u32 4294901760, %v54_v5  ;;  %s862_s1 = smov [#allocation8]  }
  0x29   :  { %v57_v10 = vsel %vm44_vm0, %v49_v7, 0  ;;  %v60_v11 = vsel %vm44_vm0, %v50_v8, 0  ;;  %v721_v12 = vpack.c.bf16 %v66_v4, %v63_v3  ;;  %v153_v15 = vsub.f32 %v51_v0, %v63_v3  ;;  %s606_s6 = sshll.u32 %s862_s1, 4  ;;  %s607_s6 = int_to_ptr.vmem [resolvable:$true] %s606_s6 }
  0x2a   :  { %v910_v13 = vand.u32 4294901760, %v57_v10  ;;  %v912_v14 = vand.u32 4294901760, %v60_v11  ;;  %v725_v16 = vpack.c.bf16 %v72_v9, %v69_v6  ;;  %v160_v17 = vsub.f32 %v52_v1, %v66_v4  ;;  %s829_s7 = scalar_lea.vmem %s607_s6, 256  ;;  %p834_p3 = scmp.lt.s32.totalorder %s607_s6, %s607_s6 }
  0x2b   :  { %v167_v18 = vsub.f32 %v53_v2, %v69_v6  ;;  %v174_v19 = vsub.f32 %v54_v5, %v72_v9  ;;  %722 = vmatprep.subr.bf16.mxu1 %v721_v12  ;;  %746 = vmatprep.subr.bf16.mxu0 %v721_v12  ;;  %v154_v22 = vand.u32 4294901760, %v153_v15  ;;  %p830_p2 = scmp.ne.s32.totalorder %s607_s6, %s829_s7  ;;  %p835_p4 = scmp.lt.s32.totalorder %s829_s7, %s829_s7 }
  0x2c   :  { %v132_v20 = vsub.f32 %v57_v10, %v910_v13  ;;  %v142_v21 = vsub.f32 %v60_v11, %v912_v14  ;;  %724 = vmatpush3.bf16.msra.mxu1 %v721_v12  ;;  %748 = vmatpush3.bf16.msra.mxu0 %v721_v12  ;;  %v161_v23 = vand.u32 4294901760, %v160_v17  ;;  %v737_v44 = vpack.c.bf16 %v160_v17, %v153_v15 }
  0x2d   :  { %v168_v24 = vand.u32 4294901760, %v167_v18  ;;  %v175_v25 = vand.u32 4294901760, %v174_v19  ;;  %726 = vmatprep.subr.bf16.mxu1 %v725_v16  ;;  %750 = vmatprep.subr.bf16.mxu0 %v725_v16  ;;  %v155_v28 = vsub.f32 %v153_v15, %v154_v22  ;;  %v741_v45 = vpack.c.bf16 %v174_v19, %v167_v18  ;;  %p836_p5 = por %p835_p4, %p834_p3 }
  0x2e   :  { %v133_v26 = vand.u32 4294901760, %v132_v20  ;;  %v143_v27 = vand.u32 4294901760, %v142_v21  ;;  %v162_v29 = vsub.f32 %v160_v17, %v161_v23  ;;  %v753_v30 = vpack.c.bf16 %v161_v23, %v154_v22  ;;  %v48_v48 = vld [vmem:[#allocation2 + $0x8] sm:$0xff]  ;;  %v47_v52 = vld [vmem:[#allocation2] sm:$0xff] }
  0x2f   :  { %v169_v31 = vsub.f32 %v167_v18, %v168_v24  ;;  %v176_v32 = vsub.f32 %v174_v19, %v175_v25  ;;  %v156_v35 = vand.u32 4294901760, %v155_v28  ;;  %v757_v43 = vpack.c.bf16 %v175_v25, %v168_v24  ;;  %p837_p6 = pnand %p836_p5, %p830_p2 }
  0x30   :  { %v134_v33 = vsub.f32 %v132_v20, %v133_v26  ;;  %696 = vmatprep.mubr.f32.mxu0 %v133_v26  ;;  %v144_v34 = vsub.f32 %v142_v21, %v143_v27  ;;  %728 = vmatpush3.bf16.msra.mxu1 %v725_v16  ;;  %v163_v36 = vand.u32 4294901760, %v162_v29 }
  0x31   :  { %752 = vmatpush3.bf16.msra.mxu0 %v725_v16  ;;  %v170_v37 = vand.u32 4294901760, %v169_v31  ;;  %v177_v38 = vand.u32 4294901760, %v176_v32 }
  0x32   :  { %v135_v39 = vand.u32 4294901760, %v134_v33  ;;  %v145_v40 = vand.u32 4294901760, %v144_v34  ;;  %754 = vmatprep.subr.bf16.mxu0 %v753_v30  ;;  %v729_v41 = vpack.c.bf16 %v163_v36, %v156_v35 }
  0x33   :  { %v733_v42 = vpack.c.bf16 %v177_v38, %v170_v37 }
  0x34   :  { %663 = vmatprep.mubr.f32.mxu1 %v135_v39  ;;  %697 = vmatmul.mubr.f32.vlgmr.msra.gmra.mrb[0].mxu0 %v143_v27 }
  0x35   :  { %664 = vmatmul.mubr.f32.vlgmr.msra.gmra.mrb[0].mxu1 %v145_v40  ;;  %730 = vmatprep.subr.bf16.mxu1 %v729_v41 }
  0x36   :  { %732 = vmatpush3.bf16.msra.mxu1 %v729_v41  ;;  %756 = vmatpush3.bf16.msra.mxu0 %v753_v30 }
  0x37   :  { %734 = vmatprep.subr.bf16.mxu1 %v733_v42  ;;  %758 = vmatprep.subr.bf16.mxu0 %v757_v43 }
  0x38   :  { %674 = vmatprep.mubr.f32.mxu1 %v910_v13  ;;  %707 = vmatprep.mubr.f32.mxu0 %v910_v13 }
  0x3a   :  { %736 = vmatpush3.bf16.msra.mxu1 %v733_v42  ;;  %760 = vmatpush3.bf16.msra.mxu0 %v757_v43 }
  0x3b   :  { %738 = vmatprep.subr.bf16.mxu1 %v737_v44  ;;  %762 = vmatprep.subr.bf16.mxu0 %v721_v12 }
  0x3d   :  { %675 = vmatmul.mubr.f32.vlgmr.msra.gmra.mrb[0].mxu1 %v912_v14  ;;  %708 = vmatmul.mubr.f32.vlgmr.msra.gmra.mrb[0].mxu0 %v912_v14 }
  0x3e   :  { %740 = vmatpush3.bf16.msra.mxu1 %v737_v44  ;;  %764 = vmatpush3.bf16.msra.mxu0 %v721_v12 }
  0x3f   :  { %742 = vmatprep.subr.bf16.mxu1 %v741_v45  ;;  %766 = vmatprep.subr.bf16.mxu0 %v725_v16 }
  0x40   :  { %685 = vmatprep.mubr.f32.mxu1 %v132_v20  ;;  %718 = vmatprep.mubr.f32.mxu0 %v910_v13 }
  0x42   :  { %744 = vmatpush3.bf16.msra.mxu1 %v741_v45  ;;  %768 = vmatpush3.bf16.msra.mxu0 %v725_v16 }
  0x45   :  { %686 = vmatmul.mubr.f32.vlgmr.msra.gmra.mrb[0].mxu1 %v142_v21  ;;  %719 = vmatmul.mubr.f32.vlgmr.msra.gmra.mrb[0].mxu0 %v912_v14 }
 0x118   :  { %v687_v47 = vpop.f32.mrb[0].mxu1  ;;  %v720_v49 = vpop.f32.mrb[0].mxu0 }
 0x119   :  { %v769_v50 = vadd.f32 %v720_v49, %v687_v47  ;;  %v324_v51 = vpop.f32.mrb[1].mxu1  ;;  %v580_v53 = vpop.f32.mrb[1].mxu0 }
 0x11a   :  { %v770_v54 = vadd.f32 %v580_v53, %v324_v51 }
 0x11b   :  { %v591_v55 = vadd.f32 %v769_v50, %v48_v48 }
 0x11c   :  { %v590_v56 = vadd.f32 %v770_v54, %v47_v52 }
 0x11d   :  { %593 = vst.msk [vmem:[#allocation2 + $0x8] sm:$0xff] %vm44_vm0, %v591_v55 }
 0x11e   :  { %592 = vst.msk [vmem:[#allocation2] sm:$0xff] %vm44_vm0, %v590_v56 }
 0x124   :  { %v598_v57 = vld [vmem:[#allocation2 + $0x8] sm:$0xff] }
 0x125   :  { %v597_v58 = vld [vmem:[#allocation2] sm:$0xff]  ;;  %600 = vst.msk [vmem:[#allocation8 + $0x8] sm:$0xff] %vm44_vm0, %v598_v57 }
 0x126   :  { %599 = vst.msk [vmem:[#allocation8] sm:$0xff] %vm44_vm0, %v597_v58 }
 0x127   :  { %840 = shalt.err (!%p837_p6)
}
 0x128   :  { %s841_s10 = scalar_lea.hbm %s945_s2, 256 }
 0x129   :  { %p842_p7 = scmp.ne.s32.totalorder %s945_s2, %s841_s10  ;;  %p845_p8 = scmp.lt.u32.totalorder %s841_s10, %s945_s2 }
 0x12b   :  { %p847_p9 = pnand %p845_p8, %p842_p7 }
 0x12d   :  { %850 = shalt.err (!%p847_p9)
}
 0x12e   :  { %612 = dma.vmem_to_hbm [thread:$0]  %s607_s6, 256, %s945_s2, [#allocation5], %s858_s19, %s858_s19, %s859_s20  }
 0x12f   :  { %855 = dma.done.wait [#allocation5], 256  }
 0x130   :  { %856 = vsyncadd [#allocation5], 4294967040 }
 0x131   :  { %616 = vsyncpa [#allocation4], 1 }
 0x132   :  { %617 = vsyncpa [#allocation7], 1 }
 0x133   :  { %618 = vsyncpa [#allocation5], 1 }

</bundles_post_ra>
